<compile_context>
chip_gen: v7x
topology: tpu7x:2x2x1
jax: 0.10.0
libtpu: 0.0.40
codegen_flags: <defaults>
</compile_context>

<pallas_src>
import jax
import jax.numpy as jnp
from jax.experimental import pallas as pl
from jax.experimental.pallas import tpu as pltpu


# --------------------------------------------------------------------------
# Fused kernel: streamed one-hot gather + masked L1 + normalization
# --------------------------------------------------------------------------
def _fused_reg_loss_kernel(ind_ref, mask_ref, target_ref, feat_ref, loss_ref,
                           acc_ref, num_ref):
    """Grid = (B, HW // T).

    ind_ref:    (1, M)  int32   spatial indices for this batch
    mask_ref:   (M, 1)  f32     object mask
    target_ref: (M, D)  f32     regression targets for this batch
    feat_ref:   (D, T)  f32     one HW-tile of the feature map (lane-dense)
    loss_ref:   (1, D)  f32     output (same block for every grid step)
    acc_ref:    (D, M)  f32     per-batch gathered predictions (scratch)
    num_ref:    (1, 1)  f32     running sum of mask (scratch)
    """
    b = pl.program_id(0)
    t = pl.program_id(1)
    nb = pl.num_programs(0)
    nt = pl.num_programs(1)

    tile = feat_ref.shape[-1]     # T (static)
    m_objs = ind_ref.shape[-1]    # M (static)

    @pl.when(jnp.logical_and(b == 0, t == 0))
    def _init_global():
        loss_ref[...] = jnp.zeros_like(loss_ref)
        num_ref[...] = jnp.zeros_like(num_ref)

    @pl.when(t == 0)
    def _init_batch():
        acc_ref[...] = jnp.zeros_like(acc_ref)

    # ---- streamed one-hot gather on the MXU:  acc(D, M) += feat @ onehot ----
    feat = feat_ref[...].astype(jnp.float32)                       # (D, T)
    ind_row = ind_ref[...]                                          # (1, M) int32
    pos = jax.lax.broadcasted_iota(jnp.int32, (tile, m_objs), 0) + t * tile
    onehot = (pos == ind_row).astype(jnp.float32)                   # (T, M)
    acc_ref[...] += jnp.dot(feat, onehot,
                            preferred_element_type=jnp.float32)     # (D, M)

    # ---- per-batch masked-L1 contribution (last HW tile of this batch) ----
    @pl.when(t == nt - 1)
    def _finalize_batch():
        pred = jnp.transpose(acc_ref[...])                          # (M, D)
        tgt = target_ref[...].astype(jnp.float32)                   # (M, D)
        msk = mask_ref[...]                                         # (M, 1)
        # mask *= isnotnan(target)  (faithful to torch: 0 * NaN still poisons)
        w = msk * jnp.logical_not(jnp.isnan(tgt)).astype(jnp.float32)
        diff = jnp.abs(pred * w - tgt * w)                          # (M, D)
        loss_ref[...] += jnp.sum(diff, axis=0, keepdims=True)       # (1, D)
        num_ref[...] += jnp.sum(msk, keepdims=True)                 # (1, 1)

    # ---- global finalize: divide by clamp_min(num, 1) ----
    @pl.when(jnp.logical_and(b == nb - 1, t == nt - 1))
    def _finalize_global():
        loss_ref[...] = loss_ref[...] / jnp.maximum(num_ref[...], 1.0)


# --------------------------------------------------------------------------
# Simple kernel for the `ind is None` path (pred already (B*M, D))
# --------------------------------------------------------------------------
def _reg_loss_flat_kernel(pred_ref, target_ref, mask_ref, loss_ref):
    pred = pred_ref[...].astype(jnp.float32)     # (N, D)
    tgt = target_ref[...].astype(jnp.float32)    # (N, D)
    msk = mask_ref[...]                          # (N, 1) f32
    w = msk * jnp.logical_not(jnp.isnan(tgt)).astype(jnp.float32)
    diff = jnp.abs(pred * w - tgt * w)           # (N, D)
    num = jnp.sum(msk, keepdims=True)            # (1, 1)
    loss_ref[...] = jnp.sum(diff, axis=0, keepdims=True) / jnp.maximum(num, 1.0)


# --------------------------------------------------------------------------
# Wrapper
# --------------------------------------------------------------------------
def _pick_tile(hw):
    """Largest 128-multiple tile dividing hw, else whole row (always legal)."""
    for cand in (2048, 1024, 512, 256, 128):
        if hw % cand == 0:
            return cand
    return hw


def reg_loss_centernet(output, mask, ind=None, target=None):
    """Pallas implementation of RegLossCenterNet.forward.

    output: (B, D, H, W)   (or (B, M, D) when ind is None)
    mask:   (B, M)
    ind:    (B, M) int
    target: (B, M, D)
    returns: (D,) float32
    """
    target = jnp.asarray(target)
    B, M, D = target.shape
    mask_f = jnp.asarray(mask).astype(jnp.float32)

    if ind is None:
        pred = jnp.asarray(output).reshape(B * M, D)
        loss2d = pl.pallas_call(
            _reg_loss_flat_kernel,
            out_shape=jax.ShapeDtypeStruct((1, D), jnp.float32),
            in_specs=[pl.BlockSpec(memory_space=pltpu.MemorySpace.VMEM)] * 3,
            out_specs=pl.BlockSpec(memory_space=pltpu.MemorySpace.VMEM),
        )(pred, target.reshape(B * M, D), mask_f.reshape(B * M, 1))
        return loss2d.reshape(D)

    output = jnp.asarray(output)
    _, _, H, W = output.shape
    HW = H * W
    # Native layout: trailing-dim merge only (no transpose, no upcast).
    feat = output.reshape(B, D, HW)

    T = _pick_tile(HW)
    nt = HW // T

    ind3 = jnp.asarray(ind).astype(jnp.int32).reshape(B, 1, M)
    mask3 = mask_f.reshape(B, M, 1)

    loss2d = pl.pallas_call(
        _fused_reg_loss_kernel,
        out_shape=jax.ShapeDtypeStruct((1, D), jnp.float32),
        grid_spec=pltpu.PrefetchScalarGridSpec(
            num_scalar_prefetch=0,
            grid=(B, nt),
            in_specs=[
                pl.BlockSpec((None, 1, M), lambda b, t: (b, 0, 0)),   # ind
                pl.BlockSpec((None, M, 1), lambda b, t: (b, 0, 0)),   # mask
                pl.BlockSpec((None, M, D), lambda b, t: (b, 0, 0)),   # target
                pl.BlockSpec((None, D, T), lambda b, t: (b, 0, t)),   # feature tile
            ],
            out_specs=pl.BlockSpec((1, D), lambda b, t: (0, 0)),
            scratch_shapes=[
                pltpu.VMEM((D, M), jnp.float32),   # per-batch gathered pred
                pltpu.VMEM((1, 1), jnp.float32),   # running sum of mask
            ],
        ),
        compiler_params=pltpu.CompilerParams(
            # The single output block is accumulated across BOTH grid axes, so
            # both must be "arbitrary".  (2-TC parallelism on v7x would need a
            # per-batch partial output + a tiny epilogue HLO; not worth it at
            # these sizes.)
            dimension_semantics=("arbitrary", "arbitrary"),
        ),
    )(ind3, mask3, target, feat)
    return loss2d.reshape(D)


# --------------------------------------------------------------------------
# Pure-JAX references (verification only)
# --------------------------------------------------------------------------
def _reference_reg_loss(pred, target, mask):
    num = mask.astype(jnp.float32).sum()
    w = mask.astype(jnp.float32)[..., None] * jnp.logical_not(
        jnp.isnan(target)).astype(jnp.float32)
    loss = jnp.abs(pred * w - target * w)      # (B, M, D)
    return loss.sum(axis=(0, 1)) / jnp.maximum(num, 1.0)


def _reference_gathered(output, mask, ind, target):
    B, D, H, W = output.shape
    featv = jnp.transpose(output, (0, 2, 3, 1)).reshape(B, H * W, D)
    pred = jnp.take_along_axis(featv, ind[..., None].astype(jnp.int32), axis=1)
    return _reference_reg_loss(pred, target, mask)


if __name__ == "__main__":
    key = jax.random.PRNGKey(0)
    B, D, H, W, M = 2, 4, 16, 16, 8

    k1, k2, k3, k4, k5 = jax.random.split(key, 5)
    output = jax.random.normal(k1, (B, D, H, W), dtype=jnp.float32)
    target = jax.random.normal(k2, (B, M, D), dtype=jnp.float32)
    ind = jax.random.randint(k3, (B, M), 0, H * W, dtype=jnp.int32)
    mask = (jax.random.uniform(k4, (B, M)) > 0.3).astype(jnp.float32)

    # Main path: fused gather + masked L1
    loss = jax.block_until_ready(
        reg_loss_centernet(output, mask, ind=ind, target=target))
    ref = _reference_gathered(output, mask, ind, target)
    assert loss.shape == (D,)
    assert jnp.allclose(loss, ref, atol=1e-5, rtol=1e-5), (loss, ref)

    # ind=None path: output already (B, M, D)
    pred_direct = jax.random.normal(k5, (B, M, D), dtype=jnp.float32)
    loss2 = jax.block_until_ready(
        reg_loss_centernet(pred_direct, mask, ind=None, target=target))
    ref2 = _reference_reg_loss(pred_direct, target, mask)
    assert jnp.allclose(loss2, ref2, atol=1e-5, rtol=1e-5), (loss2, ref2)

    print("KERNEL_OK")
</pallas_src>

<mosaic_0001>
module attributes {stable_mosaic.version = 11 : i64} {
  func.func @_fused_reg_loss_kernel(%arg0: i32, %arg1: i32, %arg2: memref<1x1x8xi32, #tpu.memory_space<vmem>>, %arg3: memref<1x8x1xf32, #tpu.memory_space<vmem>>, %arg4: memref<1x8x4xf32, #tpu.memory_space<vmem>>, %arg5: memref<1x4x256xf32, #tpu.memory_space<vmem>>, %arg6: memref<1x4xf32, #tpu.memory_space<vmem>>, %arg7: memref<4x8xf32, #tpu.memory_space<vmem>>, %arg8: memref<1x1xf32, #tpu.memory_space<vmem>>) attributes {dimension_semantics = [#tpu.dimension_semantics<arbitrary>, #tpu.dimension_semantics<arbitrary>], iteration_bounds = array<i64: 2, 1>, scalar_prefetch = 0 : i64, scratch_operands = 2 : i64, tpu.core_type = #tpu.core_type<tc>, window_params = [{transform_indices = @transform_0, window_bounds = array<i64: 1, 1, 8>}, {transform_indices = @transform_1, window_bounds = array<i64: 1, 8, 1>}, {transform_indices = @transform_2, window_bounds = array<i64: 1, 8, 4>}, {transform_indices = @transform_3, window_bounds = array<i64: 1, 4, 256>}, {pipeline_mode = #tpu.pipeline_mode<synchronous>, transform_indices = @transform_4, window_bounds = array<i64: 1, 4>}]} {
    %c0_i32 = arith.constant 0 : i32
    %0 = arith.cmpi eq, %arg0, %c0_i32 : i32
    %c0_i32_0 = arith.constant 0 : i32
    %1 = arith.cmpi eq, %arg1, %c0_i32_0 : i32
    %2 = arith.andi %0, %1 : i1
    %3 = arith.extui %2 : i1 to i32
    %c0_i32_1 = arith.constant 0 : i32
    %4 = arith.cmpi ne, %3, %c0_i32_1 : i32
    scf.if %4 {
      %cst_17 = arith.constant 0.000000e+00 : f32
      %32 = vector.broadcast %cst_17 : f32 to vector<1x4xf32>
      %c0_18 = arith.constant 0 : index
      %c0_19 = arith.constant 0 : index
      %33 = vector.load %arg6[%c0_18, %c0_19] : memref<1x4xf32, #tpu.memory_space<vmem>>, vector<1x4xf32>
      tpu.vector_store %arg6[%c0_18, %c0_19], %32 {strides = array<i32>} : memref<1x4xf32, #tpu.memory_space<vmem>>, vector<1x4xf32>,
      %cst_20 = arith.constant 0.000000e+00 : f32
      %34 = vector.broadcast %cst_20 : f32 to vector<1x1xf32>
      %c0_21 = arith.constant 0 : index
      %c0_22 = arith.constant 0 : index
      %35 = vector.load %arg8[%c0_21, %c0_22] : memref<1x1xf32, #tpu.memory_space<vmem>>, vector<1x1xf32>
      tpu.vector_store %arg8[%c0_21, %c0_22], %34 {strides = array<i32>} : memref<1x1xf32, #tpu.memory_space<vmem>>, vector<1x1xf32>,
    } else {
    }
    %c0_i32_2 = arith.constant 0 : i32
    %5 = arith.cmpi eq, %arg1, %c0_i32_2 : i32
    %6 = arith.extui %5 : i1 to i32
    %c0_i32_3 = arith.constant 0 : i32
    %7 = arith.cmpi ne, %6, %c0_i32_3 : i32
    scf.if %7 {
      %cst_17 = arith.constant 0.000000e+00 : f32
      %32 = vector.broadcast %cst_17 : f32 to vector<4x8xf32>
      %c0_18 = arith.constant 0 : index
      %c0_19 = arith.constant 0 : index
      %33 = vector.load %arg7[%c0_18, %c0_19] : memref<4x8xf32, #tpu.memory_space<vmem>>, vector<4x8xf32>
      tpu.vector_store %arg7[%c0_18, %c0_19], %32 {strides = array<i32>} : memref<4x8xf32, #tpu.memory_space<vmem>>, vector<4x8xf32>,
    } else {
    }
    %c0 = arith.constant 0 : index
    %c0_4 = arith.constant 0 : index
    %c0_5 = arith.constant 0 : index
    %8 = vector.load %arg5[%c0, %c0_4, %c0_5] : memref<1x4x256xf32, #tpu.memory_space<vmem>>, vector<1x4x256xf32>
    %9 = vector.shape_cast %8 : vector<1x4x256xf32> to vector<4x256xf32>
    %c0_6 = arith.constant 0 : index
    %c0_7 = arith.constant 0 : index
    %c0_8 = arith.constant 0 : index
    %10 = vector.load %arg2[%c0_6, %c0_7, %c0_8] : memref<1x1x8xi32, #tpu.memory_space<vmem>>, vector<1x1x8xi32>
    %11 = vector.shape_cast %10 : vector<1x1x8xi32> to vector<1x8xi32>
    %12 = tpu.iota {dimensions = array<i32: 0>} : vector<256x8xi32>
    %c256_i32 = arith.constant 256 : i32
    %13 = arith.muli %arg1, %c256_i32 : i32
    %14 = vector.broadcast %13 : i32 to vector<256x8xi32>
    %15 = arith.addi %12, %14 : vector<256x8xi32>
    %16 = vector.broadcast %11 : vector<1x8xi32> to vector<256x8xi32>
    %17 = arith.cmpi eq, %15, %16 : vector<256x8xi32>
    %18 = arith.extui %17 : vector<256x8xi1> to vector<256x8xi32>
    %19 = arith.sitofp %18 : vector<256x8xi32> to vector<256x8xf32>
    %c0_9 = arith.constant 0 : index
    %c0_10 = arith.constant 0 : index
    %20 = vector.load %arg7[%c0_9, %c0_10] : memref<4x8xf32, #tpu.memory_space<vmem>>, vector<4x8xf32>
    %cst = arith.constant dense<0.000000e+00> : vector<4x8xf32>
    %21 = tpu.matmul %9, %19, %cst {dimension_numbers = #tpu.dot_dimension_numbers<[1], [0], [0], [1], [0, 0, 1, 1], [], []>} : vector<4x256xf32>, vector<256x8xf32>, vector<4x8xf32> -> vector<4x8xf32>
    %22 = arith.addf %20, %21 : vector<4x8xf32>
    %c0_11 = arith.constant 0 : index
    %c0_12 = arith.constant 0 : index
    %23 = vector.load %arg7[%c0_11, %c0_12] : memref<4x8xf32, #tpu.memory_space<vmem>>, vector<4x8xf32>
    tpu.vector_store %arg7[%c0_11, %c0_12], %22 {strides = array<i32>} : memref<4x8xf32, #tpu.memory_space<vmem>>, vector<4x8xf32>,
    %c0_i32_13 = arith.constant 0 : i32
    %24 = arith.cmpi eq, %arg1, %c0_i32_13 : i32
    %25 = arith.extui %24 : i1 to i32
    %c0_i32_14 = arith.constant 0 : i32
    %26 = arith.cmpi ne, %25, %c0_i32_14 : i32
    scf.if %26 {
      %c0_17 = arith.constant 0 : index
      %c0_18 = arith.constant 0 : index
      %32 = vector.load %arg7[%c0_17, %c0_18] : memref<4x8xf32, #tpu.memory_space<vmem>>, vector<4x8xf32>
      %33 = tpu.transpose %32, [1, 0] : vector<4x8xf32> -> vector<8x4xf32>
      %c0_19 = arith.constant 0 : index
      %c0_20 = arith.constant 0 : index
      %c0_21 = arith.constant 0 : index
      %34 = vector.load %arg4[%c0_19, %c0_20, %c0_21] : memref<1x8x4xf32, #tpu.memory_space<vmem>>, vector<1x8x4xf32>
      %35 = vector.shape_cast %34 : vector<1x8x4xf32> to vector<8x4xf32>
      %c0_22 = arith.constant 0 : index
      %c0_23 = arith.constant 0 : index
      %c0_24 = arith.constant 0 : index
      %36 = vector.load %arg3[%c0_22, %c0_23, %c0_24] : memref<1x8x1xf32, #tpu.memory_space<vmem>>, vector<1x8x1xf32>
      %37 = vector.shape_cast %36 : vector<1x8x1xf32> to vector<8x1xf32>
      %38 = arith.cmpf one, %35, %35 : vector<8x4xf32>
      %cst_25 = arith.constant dense<true> : vector<8x4xi1>
      %39 = arith.xori %38, %cst_25 : vector<8x4xi1>
      %40 = arith.extui %39 : vector<8x4xi1> to vector<8x4xi32>
      %41 = arith.sitofp %40 : vector<8x4xi32> to vector<8x4xf32>
      %42 = vector.broadcast %37 : vector<8x1xf32> to vector<8x4xf32>
      %43 = arith.mulf %42, %41 : vector<8x4xf32>
      %44 = arith.mulf %33, %43 : vector<8x4xf32>
      %45 = arith.mulf %35, %43 : vector<8x4xf32>
      %46 = arith.subf %44, %45 : vector<8x4xf32>
      %47 = math.absf %46 : vector<8x4xf32>
      %c0_26 = arith.constant 0 : index
      %c0_27 = arith.constant 0 : index
      %48 = vector.load %arg6[%c0_26, %c0_27] : memref<1x4xf32, #tpu.memory_space<vmem>>, vector<1x4xf32>
      %cst_28 = arith.constant dense<0.000000e+00> : vector<4xf32>
      %49 = vector.multi_reduction <add>, %47, %cst_28 [0] : vector<8x4xf32> to vector<4xf32>
      %50 = vector.shape_cast %49 : vector<4xf32> to vector<1x4xf32>
      %51 = arith.addf %48, %50 : vector<1x4xf32>
      %c0_29 = arith.constant 0 : index
      %c0_30 = arith.constant 0 : index
      %52 = vector.load %arg6[%c0_29, %c0_30] : memref<1x4xf32, #tpu.memory_space<vmem>>, vector<1x4xf32>
      tpu.vector_store %arg6[%c0_29, %c0_30], %51 {strides = array<i32>} : memref<1x4xf32, #tpu.memory_space<vmem>>, vector<1x4xf32>,
      %c0_31 = arith.constant 0 : index
      %c0_32 = arith.constant 0 : index
      %53 = vector.load %arg8[%c0_31, %c0_32] : memref<1x1xf32, #tpu.memory_space<vmem>>, vector<1x1xf32>
      %54 = vector.shape_cast %37 : vector<8x1xf32> to vector<1x8x1xf32>
      %cst_33 = arith.constant dense<0.000000e+00> : vector<1xf32>
      %55 = vector.multi_reduction <add>, %54, %cst_33 [1, 2] : vector<1x8x1xf32> to vector<1xf32>
      %56 = vector.shape_cast %55 : vector<1xf32> to vector<1x1x1xf32>
      %57 = vector.extract %56[0, 0, 0] : f32 from vector<1x1x1xf32>
      %58 = vector.broadcast %57 : f32 to vector<1x1xf32>
      %59 = arith.addf %53, %58 : vector<1x1xf32>
      %c0_34 = arith.constant 0 : index
      %c0_35 = arith.constant 0 : index
      %60 = vector.load %arg8[%c0_34, %c0_35] : memref<1x1xf32, #tpu.memory_space<vmem>>, vector<1x1xf32>
      tpu.vector_store %arg8[%c0_34, %c0_35], %59 {strides = array<i32>} : memref<1x1xf32, #tpu.memory_space<vmem>>, vector<1x1xf32>,
    } else {
    }
    %c1_i32 = arith.constant 1 : i32
    %27 = arith.cmpi eq, %arg0, %c1_i32 : i32
    %c0_i32_15 = arith.constant 0 : i32
    %28 = arith.cmpi eq, %arg1, %c0_i32_15 : i32
    %29 = arith.andi %27, %28 : i1
    %30 = arith.extui %29 : i1 to i32
    %c0_i32_16 = arith.constant 0 : i32
    %31 = arith.cmpi ne, %30, %c0_i32_16 : i32
    scf.if %31 {
      %c0_17 = arith.constant 0 : index
      %c0_18 = arith.constant 0 : index
      %32 = vector.load %arg6[%c0_17, %c0_18] : memref<1x4xf32, #tpu.memory_space<vmem>>, vector<1x4xf32>
      %c0_19 = arith.constant 0 : index
      %c0_20 = arith.constant 0 : index
      %33 = vector.load %arg8[%c0_19, %c0_20] : memref<1x1xf32, #tpu.memory_space<vmem>>, vector<1x1xf32>
      %cst_21 = arith.constant 1.000000e+00 : f32
      %34 = vector.broadcast %cst_21 : f32 to vector<1x1xf32>
      %35 = arith.maximumf %33, %34 : vector<1x1xf32>
      %36 = vector.broadcast %35 : vector<1x1xf32> to vector<1x4xf32>
      %37 = arith.divf %32, %36 : vector<1x4xf32>
      %c0_22 = arith.constant 0 : index
      %c0_23 = arith.constant 0 : index
      %38 = vector.load %arg6[%c0_22, %c0_23] : memref<1x4xf32, #tpu.memory_space<vmem>>, vector<1x4xf32>
      tpu.vector_store %arg6[%c0_22, %c0_23], %37 {strides = array<i32>} : memref<1x4xf32, #tpu.memory_space<vmem>>, vector<1x4xf32>,
    } else {
    }
    return
  }
  func.func @transform_0(%arg0: i32, %arg1: i32) -> (i32, i32, i32) {
    %c0_i32 = arith.constant 0 : i32
    %c0_i32_0 = arith.constant 0 : i32
    %c0_i32_1 = arith.constant 0 : i32
    return %arg0, %c0_i32, %c0_i32_0 : i32, i32, i32
  }
  func.func @transform_1(%arg0: i32, %arg1: i32) -> (i32, i32, i32) {
    %c0_i32 = arith.constant 0 : i32
    %c0_i32_0 = arith.constant 0 : i32
    %c0_i32_1 = arith.constant 0 : i32
    return %arg0, %c0_i32, %c0_i32_0 : i32, i32, i32
  }
  func.func @transform_2(%arg0: i32, %arg1: i32) -> (i32, i32, i32) {
    %c0_i32 = arith.constant 0 : i32
    %c0_i32_0 = arith.constant 0 : i32
    %c0_i32_1 = arith.constant 0 : i32
    return %arg0, %c0_i32, %c0_i32_0 : i32, i32, i32
  }
  func.func @transform_3(%arg0: i32, %arg1: i32) -> (i32, i32, i32) {
    %c0_i32 = arith.constant 0 : i32
    %c0_i32_0 = arith.constant 0 : i32
    return %arg0, %c0_i32, %arg1 : i32, i32, i32
  }
  func.func @transform_4(%arg0: i32, %arg1: i32) -> (i32, i32) {
    %c0_i32 = arith.constant 0 : i32
    %c0_i32_0 = arith.constant 0 : i32
    %c0_i32_1 = arith.constant 0 : i32
    return %c0_i32, %c0_i32_0 : i32, i32
  }
}

</mosaic_0001>

<bundles_post_ra>
// kernel: tpu_custom_call.1
= control target key start
LH: loop header
LB: loop body
LE: loop exit
PB: predicated region body
PF: predicated region fallthrough
CT: control target
= control target key end

     0   :  { %9 = vsyncpa [#allocation5], 0  ;;  %s996_s15 = smov 0   ;;  %s998_s16 = smov 0   ;;  %s1183_s0 = inlined_call_operand.vmem [shape: s32[2,1,8], index: 0, kind: input, shape index: {}]   ;;  %s1184_s1 = inlined_call_operand.vmem [shape: f32[2,8,1], index: 1, kind: input, shape index: {}]   ;;  %s1185_s2 = inlined_call_operand.vmem [shape: f32[2,8,4], index: 2, kind: input, shape index: {}]   ;;  %s1186_s3 = inlined_call_operand.vmem [shape: f32[2,4,256], index: 3, kind: input, shape index: {}]   ;;  %s1187_s4 = inlined_call_operand.hbm [shape: f32[1,4], index: 4, kind: output, shape index: {}]  }
   0x1   :  { %s1000_s17 = smov 0  }
   0x2 LB: > { %s716_s18 = sadd.s32 4294967295, %s962_s17   ;;  %s27_s19 = sadd.s32 1, %s958_s16  ;;  %s962_s17 = sphi %s1000_s17, %s15_s17   ;;  %s958_s16 = sphi %s998_s16, %s1190_s16   ;;  %s954_s15 = sphi %s996_s15, %s1189_s15  }
   0x3   : > { %p29_p0 = scmp.ge.s32.totalorder %s27_s19, 2  ;;  %p719_p1 = scmp.ge.s32.totalorder %s962_s17, 1 }
   0x4   : > { %p203_p2 = scmp.lt.s32.totalorder %s962_s17, 3 }
   0x5   : > { %s1192_s19 = smov (%p29_p0, %s27_s19), 0 }
   0x6   : > { %p204_p3 = pnand %p719_p1, %p203_p2 }
   0x7   : > { %p239_p4 = scmp.lt.s32.totalorder (!%p204_p3), %s954_s15, 1  ;;  %p260_p5 = scmp.eq.s32.totalorder (!%p204_p3), %s954_s15, 0 }
   0x8   : > { %207 = sbr.rel (%p204_p3) target bundleno = 474 (0x1da), region = 36 }
   0xf   : > { %s240_s20 = scalar_select %p239_p4, %s954_s15, 1 }
  0x10   : > { %265 = sbr.rel (!%p260_p5) target bundleno = 23 (0x17), region = 40  ;;  %vm266_vm0 = vcmask (%p260_p5), 24576   ;;  %vm268_vm1 = vcmask (%p260_p5), 0   ;;  %v964_v0 = vmov (%p260_p5), 0.0  }
  0x11   : > { %s241_s23 = scalar_lea.vmem %s1183_s0, %s240_s20  ;;  %s1023_s24 = sshll.u32 %s240_s20, 3  ;;  %267 = vst.msk [vmem:[#allocation4] sm:$0x1] (%p260_p5), %vm266_vm0, %v964_v0 }
  0x12   : > { %s245_s27 = scalar_lea.vmem %s1184_s1, %s1023_s24  ;;  %s249_s30 = scalar_lea.vmem %s1185_s2, %s1023_s24  ;;  %269 = vst.msk [vmem:[#allocation3] sm:$0x1] (%p260_p5), %vm268_vm1, %v964_v0 }
  0x13   : > { %s258_s7 = scalar_lea.vmem %s1186_s3, %s1023_s24 }
  0x17 PF: > { %v277_v1 = vlaneseq  ;;  %v1037_v2 = vld [vmem:[%s258_s7] sm:$0xff]  ;;  %vm586_vm2 = vcmask 7168   ;;  %v965_v16 = vmov 1.0|1.0   ;;  %v966_v40 = vmov 0.0   ;;  %p601_p6 = scmp.eq.s32.totalorder %s954_s15, 1 }
  0x18   : > { %v1039_v3 = vld [vmem:[%s245_s27] sm:$0xff]  ;;  %v446_v5 = vcombine.high %v1037_v2, %v1037_v2  ;;  %v967_v41 = vmov 0  }
  0x19   : > { %v1041_v4 = vld [vmem:[%s241_s23] ss:$0 sm:$0xff]  ;;  %v1045_v6 = vshrl.u32 %v277_v1, 7  ;;  %v587_v7 = vsel %vm586_vm2, %v1039_v3, 0.0  ;;  %905 = vset.pattern.permute.xlu0 %v967_v41  ;;  %v585_v55 = vld [vmem:[#allocation3] sm:$0x1] }
  0x1a   : > { %512 = vmatprep.mubr.f32.mxu0 %v446_v5  ;;  %588 = vadd.xlane.f32.xlu0 %v587_v7  ;;  %v557_v58 = vld [vmem:[%s249_s30] sm:$0xff] }
  0x1b   : > { %v294_v8 = vadd.s32 128, %v1045_v6  ;;  %v295_v9 = vadd.s32 136, %v1045_v6  ;;  %v279_v10 = vadd.s32 8, %v1045_v6  ;;  %vm348_vm3 = vcmp.eq.s32.totalorder %v1045_v6, %v1041_v4 }
  0x1c   : > { %v296_v11 = vadd.s32 144, %v1045_v6  ;;  %v297_v12 = vadd.s32 152, %v1045_v6  ;;  %v280_v13 = vadd.s32 16, %v1045_v6  ;;  %v281_v14 = vadd.s32 24, %v1045_v6 }
  0x1d   : > { %vm364_vm4 = vcmp.eq.s32.totalorder %v294_v8, %v1041_v4  ;;  %vm365_vm5 = vcmp.eq.s32.totalorder %v295_v9, %v1041_v4  ;;  %vm349_vm6 = vcmp.eq.s32.totalorder %v279_v10, %v1041_v4  ;;  %v298_v15 = vadd.s32 160, %v1045_v6  ;;  %v573_v10 = vld [vmem:[#allocation4] sm:$0x1] }
  0x1e   : > { %vm834_vm7 = vmpackc.low %vm365_vm5, %vm364_vm4  ;;  %vm366_vm8 = vcmp.eq.s32.totalorder %v296_v11, %v1041_v4  ;;  %vm367_vm9 = vcmp.eq.s32.totalorder %v297_v12, %v1041_v4  ;;  %vm350_vm10 = vcmp.eq.s32.totalorder %v280_v13, %v1041_v4  ;;  %vm351_vm11 = vcmp.eq.s32.totalorder %v281_v14, %v1041_v4 }
  0x1f   : > { %835 = vmatprep.subr.msk.bf16.mxu0 %vm834_vm7, %v965_v16  ;;  %vm836_vm12 = vmpackc.low %vm349_vm6, %vm348_vm3  ;;  %v299_v17 = vadd.s32 168, %v1045_v6  ;;  %vm368_vm13 = vcmp.eq.s32.totalorder %v298_v15, %v1041_v4  ;;  %v282_v18 = vadd.s32 32, %v1045_v6  ;;  %v283_v19 = vadd.s32 40, %v1045_v6 }
  0x20   : > { %837 = vmatpush3.bf16.msk.msra.mxu0 %vm836_vm12, %v965_v16  ;;  %vm838_vm14 = vmpackc.low %vm367_vm9, %vm366_vm8  ;;  %v300_v20 = vadd.s32 176, %v1045_v6  ;;  %v301_v21 = vadd.s32 184, %v1045_v6  ;;  %v284_v22 = vadd.s32 48, %v1045_v6  ;;  %v285_v23 = vadd.s32 56, %v1045_v6 }
  0x21   : > { %839 = vmatprep.subr.msk.bf16.mxu0 %vm838_vm14, %v965_v16  ;;  %vm840_vm15 = vmpackc.low %vm351_vm11, %vm350_vm10  ;;  %vm369_vm0 = vcmp.eq.s32.totalorder %v299_v17, %v1041_v4  ;;  %vm352_vm2 = vcmp.eq.s32.totalorder %v282_v18, %v1041_v4  ;;  %vm353_vm3 = vcmp.eq.s32.totalorder %v283_v19, %v1041_v4  ;;  %v302_v24 = vadd.s32 192, %v1045_v6 }
  0x22   : > { %vm842_vm1 = vmpackc.low %vm369_vm0, %vm368_vm13  ;;  %vm370_vm4 = vcmp.eq.s32.totalorder %v300_v20, %v1041_v4  ;;  %vm371_vm5 = vcmp.eq.s32.totalorder %v301_v21, %v1041_v4  ;;  %v303_v25 = vadd.s32 200, %v1045_v6  ;;  %vm354_vm8 = vcmp.eq.s32.totalorder %v284_v22, %v1041_v4 }
  0x23   : > { %vm844_vm6 = vmpackc.low %vm353_vm3, %vm352_vm2  ;;  %vm355_vm9 = vcmp.eq.s32.totalorder %v285_v23, %v1041_v4  ;;  %v286_v26 = vadd.s32 64, %v1045_v6  ;;  %v287_v27 = vadd.s32 72, %v1045_v6  ;;  %vm372_vm10 = vcmp.eq.s32.totalorder %v302_v24, %v1041_v4 }
  0x24   : > { %841 = vmatpush3.bf16.msk.msra.mxu0 %vm840_vm15, %v965_v16  ;;  %vm846_vm7 = vmpackc.low %vm371_vm5, %vm370_vm4  ;;  %vm373_vm11 = vcmp.eq.s32.totalorder %v303_v25, %v1041_v4  ;;  %v304_v28 = vadd.s32 208, %v1045_v6  ;;  %v305_v29 = vadd.s32 216, %v1045_v6  ;;  %v288_v30 = vadd.s32 80, %v1045_v6 }
  0x25   : > { %843 = vmatprep.subr.msk.bf16.mxu0 %vm842_vm1, %v965_v16  ;;  %vm848_vm12 = vmpackc.low %vm355_vm9, %vm354_vm8  ;;  %vm356_vm14 = vcmp.eq.s32.totalorder %v286_v26, %v1041_v4  ;;  %vm357_vm15 = vcmp.eq.s32.totalorder %v287_v27, %v1041_v4  ;;  %v289_v31 = vadd.s32 88, %v1045_v6  ;;  %v306_v32 = vadd.s32 224, %v1045_v6 }
  0x26   : > { %vm850_vm13 = vmpackc.low %vm373_vm11, %vm372_vm10  ;;  %vm374_vm0 = vcmp.eq.s32.totalorder %v304_v28, %v1041_v4  ;;  %vm375_vm1 = vcmp.eq.s32.totalorder %v305_v29, %v1041_v4  ;;  %v307_v33 = vadd.s32 232, %v1045_v6  ;;  %vm358_vm4 = vcmp.eq.s32.totalorder %v288_v30, %v1041_v4 }
  0x27   : > { %vm852_vm2 = vmpackc.low %vm357_vm15, %vm356_vm14  ;;  %vm359_vm5 = vcmp.eq.s32.totalorder %v289_v31, %v1041_v4  ;;  %v290_v34 = vadd.s32 96, %v1045_v6  ;;  %v291_v35 = vadd.s32 104, %v1045_v6  ;;  %v308_v36 = vadd.s32 240, %v1045_v6 }
  0x28   : > { %845 = vmatpush3.bf16.msk.msra.mxu0 %vm844_vm6, %v965_v16  ;;  %vm854_vm3 = vmpackc.low %vm375_vm1, %vm374_vm0  ;;  %vm376_vm6 = vcmp.eq.s32.totalorder %v306_v32, %v1041_v4  ;;  %v309_v37 = vadd.s32 248, %v1045_v6  ;;  %v292_v38 = vadd.s32 112, %v1045_v6  ;;  %v293_v39 = vadd.s32 120, %v1045_v6 }
  0x29   : > { %847 = vmatprep.subr.msk.bf16.mxu0 %vm846_vm7, %v965_v16  ;;  %vm377_vm7 = vcmp.eq.s32.totalorder %v307_v33, %v1041_v4  ;;  %vm856_vm8 = vmpackc.low %vm359_vm5, %vm358_vm4  ;;  %vm360_vm10 = vcmp.eq.s32.totalorder %v290_v34, %v1041_v4  ;;  %vm361_vm11 = vcmp.eq.s32.totalorder %v291_v35, %v1041_v4  ;;  %vm599_vm4 = vcmask 0  }
  0x2a   : > { %vm858_vm9 = vmpackc.low %vm377_vm7, %vm376_vm6  ;;  %vm362_vm0 = vcmp.eq.s32.totalorder %v292_v38, %v1041_v4  ;;  %vm363_vm1 = vcmp.eq.s32.totalorder %v293_v39, %v1041_v4  ;;  %vm559_vm5 = vcmp.ne.f32.partialorder %v557_v58, %v557_v58  ;;  %vm968_vm6 = vmmov 1  }
  0x2b   : > { %vm860_vm14 = vmpackc.low %vm361_vm11, %vm360_vm10  ;;  %v969_v14 = vmov (%p601_p6), 0  }
  0x2c   : > { %849 = vmatpush3.bf16.msk.msra.mxu0 %vm848_vm12, %v965_v16  ;;  %vm378_vm12 = vcmp.eq.s32.totalorder %v308_v36, %v1041_v4  ;;  %vm560_vm7 = vmxor %vm559_vm5, %vm968_vm6 }
  0x2d   : > { %851 = vmatprep.subr.msk.bf16.mxu0 %vm850_vm13, %v965_v16  ;;  %vm379_vm13 = vcmp.eq.s32.totalorder %v309_v37, %v1041_v4  ;;  %v790_v60 = vsel %vm560_vm7, 1.0, %v966_v40 }
  0x2e   : > { %vm862_vm15 = vmpackc.low %vm379_vm13, %vm378_vm12 }
  0x30   : > { %853 = vmatpush3.bf16.msk.msra.mxu0 %vm852_vm2, %v965_v16  ;;  %vm864_vm2 = vmpackc.low %vm363_vm1, %vm362_vm0  ;;  %565 = vperm.xlu0 %905, %v1039_v3  }
  0x31   : > { %855 = vmatprep.subr.msk.bf16.mxu0 %vm854_vm3, %v965_v16  ;;  %vm273_vm3 = vcmask 60416  }
  0x32   : > { %274 = vst.msk [vmem:[#allocation2] sm:$0xf] %vm273_vm3, %v966_v40 }
  0x34   : > { %857 = vmatpush3.bf16.msk.msra.mxu0 %vm856_vm8, %v965_v16  ;;  %vm574_vm8 = vcmask 31744   ;;  %907 = vset.pattern.permute.xlu0 (%p601_p6), %v969_v14 }
  0x35   : > { %859 = vmatprep.subr.msk.bf16.mxu0 %vm858_vm9, %v965_v16  ;;  %vm583_vm9 = vcmask 24576  }
  0x38   : > { %861 = vmatpush3.bf16.msk.msra.mxu0 %vm860_vm14, %v965_v16 }
  0x39   : > { %863 = vmatprep.subr.msk.bf16.mxu0 %vm862_vm15, %v965_v16  ;;  %v444_v50 = vld [vmem:[#allocation2] sm:$0xf] }
  0x3c   : > { %865 = vmatpush3.bf16.msk.msra.mxu0 %vm864_vm2, %v965_v16  ;;  %v616_v16 = vsub.s32 (%p601_p6), 0, %v1045_v6 }
  0x3f   : > { %513 = vmatmul.mubr.f32.vlgmr.msra.gmra.mrb[0].mxu0 %v1037_v2 }
  0xa7   : > { %v589_v42 = vpop.xlane.xlu0 %588 }
  0xa8   : > { %v590_v43 = vrot.slane %v589_v42, 4 }
  0xaa   : > { %v591_v44 = vadd.f32 %v590_v43, %v589_v42 }
  0xac   : > { %v592_v45 = vrot.slane %v591_v44, 2 }
  0xae   : > { %v593_v46 = vadd.f32 %v592_v45, %v591_v44 }
  0xaf   : > { %v566_v59 = vpop.permute.xlu0 %565 }
  0xb0   : > { %v594_v47 = vrot.slane %v593_v46, 1  ;;  %v568_v61 = vmul.f32 %v790_v60, %v566_v59 }
  0xb2   : > { %v595_v48 = vadd.f32 %v594_v47, %v593_v46  ;;  %v570_v62 = vmul.f32 %v568_v61, %v557_v58 }
  0xb4   : > { %866 = vpush %v595_v48 }
  0xe5   : > { %s867_s8 = spop %866 }
  0xe6   : > { %v597_v56 = vstv %s867_s8 }
  0xe7   : > { %v598_v57 = vadd.f32 %v597_v56, %v585_v55 }
  0xe9   : > { %600 = vst.msk [vmem:[#allocation3] sm:$0x1] %vm599_vm4, %v598_v57 }
  0xf0   : > { %v607_v13 = vld [vmem:[#allocation3] sm:$0x1] (%p601_p6) }
  0xf1   : > { %v608_v15 = vmax.f32 (%p601_p6), %v607_v13, 1.0 }
  0xf3   : > { %611 = vperm.xlu0 (%p601_p6), %907, %v608_v15  }
 0x112   : > { %v831_v49 = vpop.f32.mrb[0].mxu0 }
 0x113   : > { %v832_v51 = vpop.f32.mrb[1].mxu0 }
 0x114   : > { %v833_v52 = vadd.f32 %v832_v51, %v831_v49 }
 0x116   : > { %v518_v53 = vadd.f32 %v833_v52, %v444_v50 }
 0x118   : > { %520 = vst.msk [vmem:[#allocation2] sm:$0xf] %vm273_vm3, %v518_v53 }
 0x11f   : > { %v524_v54 = vld [vmem:[#allocation2] sm:$0xf] }
 0x120   : > { %525 = vxpose.xlu1.b32.start.end [1/1] (short) (narrow) %v524_v54, 8 }
 0x172   : > { %v612_v17 = vpop.permute.xlu0 (%p601_p6), %611 }
 0x173   : > { %v617_v18 = vrot.slane (%p601_p6), %v612_v17, %v616_v16 }
 0x175   : > { %908 = vrcp.f32 (%p601_p6), %v617_v18 }
 0x17f   : > { %v909_v20 = vpop.eup (%p601_p6), %908 }
 0x1a0   : > { %v541_v63 = vpop.trf.xlu1 }
 0x1a1   : > { %v569_v0 = vmul.f32 %v568_v61, %v541_v63 }
 0x1a3   : > { %v571_v1 = vsub.f32 %v569_v0, %v570_v62 }
 0x1a5   : > { %v572_v2 = vand.u32 2147483647, %v571_v1 }
 0x1a7   : > { %v575_v3 = vsel %vm574_vm8, %v572_v2, 0.0 }
 0x1a8   : > { %v576_v4 = vrot.slane %v575_v3, 4 }
 0x1aa   : > { %v577_v5 = vadd.f32 %v576_v4, %v575_v3 }
 0x1ac   : > { %v578_v7 = vrot.slane %v577_v5, 2 }
 0x1ae   : > { %v579_v8 = vadd.f32 %v578_v7, %v577_v5 }
 0x1b0   : > { %v580_v9 = vrot.slane %v579_v8, 1  ;;  %605 = sbr.rel (!%p601_p6) target bundleno = 449 (0x1c1), region = 52 }
 0x1b2   : > { %v581_v11 = vadd.f32 %v580_v9, %v579_v8 }
 0x1b4   : > { %v582_v12 = vadd.f32 %v581_v11, %v573_v10 }
 0x1b6   : > { %584 = vst.msk [vmem:[#allocation4] sm:$0x1] %vm583_vm9, %v582_v12 }
 0x1bd   : > { %v606_v19 = vld [vmem:[#allocation4] sm:$0x1] }
 0x1be   : > { %v619_v21 = vmul.f32 %v909_v20, %v606_v19 }
 0x1c0   : > { %621 = vst.msk [vmem:[#allocation4] sm:$0x1] %vm583_vm9, %v619_v21 }
 0x1c1 PF: > { %p1148_p7 = scmp.eq.s32.totalorder %s716_s18, 1  ;;  %s970_s12 = smov [#allocation4]  }
 0x1c2   : > { %s629_s13 = sshll.u32 %s970_s12, 4  ;;  %s630_s13 = int_to_ptr.vmem [resolvable:$true] %s629_s13 }
 0x1c3   : > { %s910_s14 = scalar_lea.vmem %s630_s13, 16  ;;  %s916_s15 = scalar_lea.vmem %s630_s13, 32 }
 0x1c4   : > { %p911_p8 = scmp.ne.s32.totalorder %s630_s13, %s910_s14  ;;  %p917_p11 = scmp.lt.s32.totalorder %s630_s13, %s630_s13 }
 0x1c5   : > { %p918_p12 = scmp.lt.s32.totalorder %s916_s15, %s910_s14 }
 0x1c6   : > { %p912_p9 = pnand %p911_p8, %p1148_p7 }
 0x1c7   : > { %p919_p13 = por %p918_p12, %p917_p11 }
 0x1c8   : > { %p913_p10 = pneg %p912_p9 }
 0x1ca   : > { %p920_p0 = pnand %p919_p13, %p913_p10 }
 0x1cc   : > { %923 = shalt.err (!%p920_p0)
}
 0x1cd   : > { %s924_s21 = scalar_lea.hbm %s1187_s4, 16 }
 0x1ce   : > { %p925_p1 = scmp.ne.s32.totalorder %s1187_s4, %s924_s21  ;;  %p930_p4 = scmp.lt.u32.totalorder %s924_s21, %s1187_s4 }
 0x1d0   : > { %p926_p2 = pnand %p925_p1, %p1148_p7 }
 0x1d2   : > { %p927_p3 = pneg %p926_p2 }
 0x1d4   : > { %p932_p5 = pnand %p930_p4, %p927_p3 }
 0x1d6   : > { %935 = shalt.err (!%p932_p5)
}
 0x1d7   : > { %869 = dma.vmem_to_hbm [thread:$0]  (%p1148_p7), %s630_s13, 16, %s1187_s4, [#allocation5]  }
 0x1d8   : > { %949 = dma.done.wait (%p1148_p7), [#allocation5], 16  }
 0x1d9   : > { %951 = vsyncadd (%p1148_p7), [#allocation5], 4294967280 }
 0x1da PF: > { %s15_s17 = sadd.s32 1, %s962_s17   ;;  %s1189_s15 = smov %s958_s16 }
 0x1db   : > { %p12_p6 = scmp.ge.s32.totalorder %s15_s17, 4   ;;  %s1190_s16 = smov %s1192_s19 }
 0x1dd   :  { %14 = sbr.rel (!%p12_p6) target bundleno = 2 (0x2), region = 88 }
 0x1e4   :  { %642 = vsyncpa [#allocation5], 1 }
 0x1e5   :  { %644 = vsyncpa [#allocation5 + $0x1], 1 }

</bundles_post_ra>
